<compile_context>
chip_gen: v7x
topology: tpu7x:2x2x1
jax: 0.10.0
libtpu: 0.0.40
codegen_flags: <defaults>
</compile_context>

<pallas_src>
import math
import jax
import jax.numpy as jnp
from jax.experimental import pallas as pl
from jax.experimental.pallas import tpu as pltpu

# ---------------- model config (small, deterministic) ----------------
B = 2        # batch
S = 8        # sequence length
D = 32       # hidden dim
H = 4        # attention heads
DH = D // H  # per-head dim
F = 4 * D    # ffn hidden dim
EPS = 1e-5
NEG = -1e9   # additive mask value for cross-batch attention entries


def _layer_norm(h, gamma, beta):
    # h: (N, D), gamma/beta: (1, D)
    mu = jnp.mean(h, axis=-1, keepdims=True)
    xc = h - mu
    var = jnp.mean(xc * xc, axis=-1, keepdims=True)
    inv = jax.lax.rsqrt(var + EPS)
    return xc * inv * gamma + beta


def transformer_layer_kernel(
    x_ref,        # (B*S, D)   flattened tokens
    wqkv_ref,     # (D, 3D)    [wq*scale | wk | wv]
    bqkv_ref,     # (1, 3D)    [bq*scale | bk | bv]
    wo_ref,       # (D, D)
    w1_ref,       # (D, F)
    b1_ref,       # (1, F)
    w2_ref,       # (F, D)
    vec_ref,      # (6+H, D)   rows: g1, be1, g2, be2, bo, b2, head-mask[0..H-1]
    bmask_ref,    # (B*S, B*S) additive mask: 0 within batch, NEG across batches
    o_ref,        # (B*S, D)
):
    x = x_ref[...]                                   # (B*S, D)

    g1, be1 = vec_ref[0:1, :], vec_ref[1:2, :]
    g2, be2 = vec_ref[2:3, :], vec_ref[3:4, :]
    bo, b2 = vec_ref[4:5, :], vec_ref[5:6, :]
    bmask = bmask_ref[...]                           # (B*S, B*S)

    # ---------------- attention branch: x + att(norm1(x)) ----------------
    h = _layer_norm(x, g1, be1)

    # single fused QKV matmul (scale already folded into the q columns)
    qkv = jnp.dot(h, wqkv_ref[...], preferred_element_type=jnp.float32) + bqkv_ref[...]
    q = qkv[:, 0 * D:1 * D]                          # (B*S, D), pre-scaled
    k = qkv[:, 1 * D:2 * D]
    v = qkv[:, 2 * D:3 * D]

    att = jnp.zeros((B * S, D), jnp.float32)
    for hd in range(H):                              # static unrolled loop, H = 4
        m = vec_ref[6 + hd:7 + hd, :]                # (1, D) lane mask for this head
        km = k * m                                   # zero out other heads' lanes
        vm = v * m
        # full-width contraction == per-head contraction because km is masked
        s = jnp.dot(q, km.T, preferred_element_type=jnp.float32)   # (B*S, B*S)
        s = s + bmask                                # kill cross-batch attention
        s = s - jnp.max(s, axis=-1, keepdims=True)
        p = jnp.exp(s)
        p = p * pl.reciprocal(jnp.sum(p, axis=-1, keepdims=True), approx=True)
        # vm is masked -> only this head's lanes are written; sum over heads is exact
        att = att + jnp.dot(p, vm, preferred_element_type=jnp.float32)

    att = jnp.dot(att, wo_ref[...], preferred_element_type=jnp.float32) + bo
    x = x + att                                      # droppath(rate=0) == identity

    # ---------------- ffn branch: x + ffn(norm2(x)) ----------------
    h2 = _layer_norm(x, g2, be2)
    f = jnp.dot(h2, w1_ref[...], preferred_element_type=jnp.float32) + b1_ref[...]
    f = jax.nn.gelu(f, approximate=True)             # tanh-approx GELU (EUP friendly)
    f = jnp.dot(f, w2_ref[...], preferred_element_type=jnp.float32) + b2

    o_ref[...] = x + f                               # single full-block store


def pack_params(params):
    """Fold/concatenate the 17 raw parameters into 8 kernel inputs."""
    (g1, be1, wq, bq, wk, bk, wv, bv, wo, bo, g2, be2, w1, bf1, w2, bf2) = params
    scale = 1.0 / math.sqrt(DH)

    wqkv = jnp.concatenate([wq * scale, wk, wv], axis=1)          # (D, 3D)
    bqkv = jnp.concatenate([bq * scale, bk, bv], axis=1)          # (1, 3D)

    lane = jnp.arange(D)
    masks = jnp.stack(
        [((lane >= hd * DH) & (lane < (hd + 1) * DH)).astype(jnp.float32)
         for hd in range(H)], axis=0)                              # (H, D)
    vec = jnp.concatenate([g1, be1, g2, be2, bo, bf2, masks], axis=0)  # (6+H, D)

    tok_b = jnp.arange(B * S) // S
    bmask = jnp.where(tok_b[:, None] == tok_b[None, :], 0.0, NEG)
    bmask = bmask.astype(jnp.float32)                              # (B*S, B*S)

    return (wqkv, bqkv, wo, w1, bf1, w2, vec, bmask)


def transformer_layer(x, params):
    wqkv, bqkv, wo, w1, b1, w2, vec, bmask = pack_params(params)
    x2 = x.reshape(B * S, D)                         # free, outside the kernel

    def full(a):
        nd = a.ndim
        return pl.BlockSpec(a.shape, lambda i, _nd=nd: (0,) * _nd)

    out = pl.pallas_call(
        transformer_layer_kernel,
        out_shape=jax.ShapeDtypeStruct((B * S, D), jnp.float32),
        grid_spec=pltpu.PrefetchScalarGridSpec(
            num_scalar_prefetch=0,
            grid=(1,),                               # batch folded into one invocation
            in_specs=[full(x2), full(wqkv), full(bqkv), full(wo),
                      full(w1), full(b1), full(w2), full(vec), full(bmask)],
            out_specs=pl.BlockSpec((B * S, D), lambda i: (0, 0)),
        ),
        compiler_params=pltpu.CompilerParams(
            dimension_semantics=("arbitrary",)),
    )(x2, wqkv, bqkv, wo, w1, b1, w2, vec, bmask)
    return out.reshape(B, S, D)


def init_params(key):
    ks = jax.random.split(key, 12)

    def lin(k, fan_in, shape):
        bound = 1.0 / math.sqrt(fan_in)
        return jax.random.uniform(k, shape, jnp.float32, -bound, bound)

    g1 = jnp.ones((1, D), jnp.float32)
    be1 = jnp.zeros((1, D), jnp.float32)
    g2 = jnp.ones((1, D), jnp.float32)
    be2 = jnp.zeros((1, D), jnp.float32)

    wq = lin(ks[0], D, (D, D)); bq = lin(ks[1], D, (1, D))
    wk = lin(ks[2], D, (D, D)); bk = lin(ks[3], D, (1, D))
    wv = lin(ks[4], D, (D, D)); bv = lin(ks[5], D, (1, D))
    wo = lin(ks[6], D, (D, D)); bo = lin(ks[7], D, (1, D))
    w1 = lin(ks[8], D, (D, F)); bf1 = lin(ks[9], D, (1, F))
    w2 = lin(ks[10], F, (F, D)); bf2 = lin(ks[11], F, (1, D))

    return (g1, be1, wq, bq, wk, bk, wv, bv, wo, bo, g2, be2, w1, bf1, w2, bf2)


def reference(x, params):
    # pure-JAX reference of the same forward pass (unfused semantics)
    (g1, be1, wq, bq, wk, bk, wv, bv, wo, bo, g2, be2, w1, bf1, w2, bf2) = params

    def ln(h, g, b):
        mu = jnp.mean(h, -1, keepdims=True)
        var = jnp.mean((h - mu) ** 2, -1, keepdims=True)
        return (h - mu) / jnp.sqrt(var + EPS) * g + b

    def one(xb):
        h = ln(xb, g1, be1)
        q = h @ wq + bq; k = h @ wk + bk; v = h @ wv + bv
        q = q.reshape(S, H, DH).transpose(1, 0, 2)
        k = k.reshape(S, H, DH).transpose(1, 0, 2)
        v = v.reshape(S, H, DH).transpose(1, 0, 2)
        sc = jnp.einsum('hqd,hkd->hqk', q, k) / math.sqrt(DH)
        p = jax.nn.softmax(sc, -1)
        a = jnp.einsum('hqk,hkd->hqd', p, v).transpose(1, 0, 2).reshape(S, D)
        xb = xb + (a @ wo + bo)
        h2 = ln(xb, g2, be2)
        f = jax.nn.gelu(h2 @ w1 + bf1, approximate=True) @ w2 + bf2
        return xb + f

    return jax.vmap(one)(x)


if __name__ == "__main__":
    key = jax.random.PRNGKey(0)
    kx, kp = jax.random.split(key)
    x = jax.random.normal(kx, (B, S, D), jnp.float32)
    params = init_params(kp)

    out = transformer_layer(x, params)
    out = jax.block_until_ready(out)

    ref = reference(x, params)
    assert out.shape == (B, S, D)
    # tolerance relaxed slightly because of approx softmax reciprocal
    assert jnp.allclose(out, ref, atol=2e-3, rtol=2e-3), (
        f"mismatch vs reference, max abs err = {float(jnp.max(jnp.abs(out - ref)))}")

    print("KERNEL_OK")
</pallas_src>

<mosaic_0001>
module attributes {stable_mosaic.version = 11 : i64} {
  func.func @transformer_layer_kernel(%arg0: i32, %arg1: memref<16x32xf32, #tpu.memory_space<vmem>>, %arg2: memref<32x96xf32, #tpu.memory_space<vmem>>, %arg3: memref<1x96xf32, #tpu.memory_space<vmem>>, %arg4: memref<32x32xf32, #tpu.memory_space<vmem>>, %arg5: memref<32x128xf32, #tpu.memory_space<vmem>>, %arg6: memref<1x128xf32, #tpu.memory_space<vmem>>, %arg7: memref<128x32xf32, #tpu.memory_space<vmem>>, %arg8: memref<10x32xf32, #tpu.memory_space<vmem>>, %arg9: memref<16x16xf32, #tpu.memory_space<vmem>>, %arg10: memref<16x32xf32, #tpu.memory_space<vmem>>) attributes {dimension_semantics = [#tpu.dimension_semantics<arbitrary>], iteration_bounds = array<i64: 1>, scalar_prefetch = 0 : i64, scratch_operands = 0 : i64, tpu.core_type = #tpu.core_type<tc>, window_params = [{pipeline_mode = #tpu.pipeline_mode<synchronous>, transform_indices = @transform_0, window_bounds = array<i64: 16, 32>}, {pipeline_mode = #tpu.pipeline_mode<synchronous>, transform_indices = @transform_1, window_bounds = array<i64: 32, 96>}, {pipeline_mode = #tpu.pipeline_mode<synchronous>, transform_indices = @transform_2, window_bounds = array<i64: 1, 96>}, {pipeline_mode = #tpu.pipeline_mode<synchronous>, transform_indices = @transform_3, window_bounds = array<i64: 32, 32>}, {pipeline_mode = #tpu.pipeline_mode<synchronous>, transform_indices = @transform_4, window_bounds = array<i64: 32, 128>}, {pipeline_mode = #tpu.pipeline_mode<synchronous>, transform_indices = @transform_5, window_bounds = array<i64: 1, 128>}, {pipeline_mode = #tpu.pipeline_mode<synchronous>, transform_indices = @transform_6, window_bounds = array<i64: 128, 32>}, {pipeline_mode = #tpu.pipeline_mode<synchronous>, transform_indices = @transform_7, window_bounds = array<i64: 10, 32>}, {pipeline_mode = #tpu.pipeline_mode<synchronous>, transform_indices = @transform_8, window_bounds = array<i64: 16, 16>}, {pipeline_mode = #tpu.pipeline_mode<synchronous>, transform_indices = @transform_9, window_bounds = array<i64: 16, 32>}]} {
    %c0 = arith.constant 0 : index
    %c0_0 = arith.constant 0 : index
    %0 = vector.load %arg1[%c0, %c0_0] : memref<16x32xf32, #tpu.memory_space<vmem>>, vector<16x32xf32>
    %c0_1 = arith.constant 0 : index
    %c0_2 = arith.constant 0 : index
    %1 = vector.load %arg8[%c0_1, %c0_2] : memref<10x32xf32, #tpu.memory_space<vmem>>, vector<1x32xf32>
    %c1 = arith.constant 1 : index
    %c0_3 = arith.constant 0 : index
    %2 = vector.load %arg8[%c1, %c0_3] : memref<10x32xf32, #tpu.memory_space<vmem>>, vector<1x32xf32>
    %c2 = arith.constant 2 : index
    %c0_4 = arith.constant 0 : index
    %3 = vector.load %arg8[%c2, %c0_4] : memref<10x32xf32, #tpu.memory_space<vmem>>, vector<1x32xf32>
    %c3 = arith.constant 3 : index
    %c0_5 = arith.constant 0 : index
    %4 = vector.load %arg8[%c3, %c0_5] : memref<10x32xf32, #tpu.memory_space<vmem>>, vector<1x32xf32>
    %c4 = arith.constant 4 : index
    %c0_6 = arith.constant 0 : index
    %5 = vector.load %arg8[%c4, %c0_6] : memref<10x32xf32, #tpu.memory_space<vmem>>, vector<1x32xf32>
    %c5 = arith.constant 5 : index
    %c0_7 = arith.constant 0 : index
    %6 = vector.load %arg8[%c5, %c0_7] : memref<10x32xf32, #tpu.memory_space<vmem>>, vector<1x32xf32>
    %c0_8 = arith.constant 0 : index
    %c0_9 = arith.constant 0 : index
    %7 = vector.load %arg9[%c0_8, %c0_9] : memref<16x16xf32, #tpu.memory_space<vmem>>, vector<16x16xf32>
    %cst = arith.constant dense<0.000000e+00> : vector<16xf32>
    %8 = vector.multi_reduction <add>, %0, %cst [1] : vector<16x32xf32> to vector<16xf32>
    %9 = vector.shape_cast %8 : vector<16xf32> to vector<16x1xf32>
    %cst_10 = arith.constant 3.200000e+01 : f32
    %10 = vector.broadcast %cst_10 : f32 to vector<16x1xf32>
    %11 = arith.divf %9, %10 : vector<16x1xf32>
    %12 = vector.broadcast %11 : vector<16x1xf32> to vector<16x32xf32>
    %13 = arith.subf %0, %12 : vector<16x32xf32>
    %14 = arith.mulf %13, %13 : vector<16x32xf32>
    %cst_11 = arith.constant dense<0.000000e+00> : vector<16xf32>
    %15 = vector.multi_reduction <add>, %14, %cst_11 [1] : vector<16x32xf32> to vector<16xf32>
    %16 = vector.shape_cast %15 : vector<16xf32> to vector<16x1xf32>
    %cst_12 = arith.constant 3.200000e+01 : f32
    %17 = vector.broadcast %cst_12 : f32 to vector<16x1xf32>
    %18 = arith.divf %16, %17 : vector<16x1xf32>
    %cst_13 = arith.constant 9.99999974E-6 : f32
    %19 = vector.broadcast %cst_13 : f32 to vector<16x1xf32>
    %20 = arith.addf %18, %19 : vector<16x1xf32>
    %21 = math.rsqrt %20 : vector<16x1xf32>
    %22 = vector.broadcast %21 : vector<16x1xf32> to vector<16x32xf32>
    %23 = arith.mulf %13, %22 : vector<16x32xf32>
    %24 = vector.broadcast %1 : vector<1x32xf32> to vector<16x32xf32>
    %25 = arith.mulf %23, %24 : vector<16x32xf32>
    %26 = vector.broadcast %2 : vector<1x32xf32> to vector<16x32xf32>
    %27 = arith.addf %25, %26 : vector<16x32xf32>
    %c0_14 = arith.constant 0 : index
    %c0_15 = arith.constant 0 : index
    %28 = vector.load %arg2[%c0_14, %c0_15] : memref<32x96xf32, #tpu.memory_space<vmem>>, vector<32x96xf32>
    %cst_16 = arith.constant dense<0.000000e+00> : vector<16x96xf32>
    %29 = tpu.matmul %27, %28, %cst_16 {dimension_numbers = #tpu.dot_dimension_numbers<[1], [0], [0], [1], [0, 0, 1, 1], [], []>} : vector<16x32xf32>, vector<32x96xf32>, vector<16x96xf32> -> vector<16x96xf32>
    %c0_17 = arith.constant 0 : index
    %c0_18 = arith.constant 0 : index
    %30 = vector.load %arg3[%c0_17, %c0_18] : memref<1x96xf32, #tpu.memory_space<vmem>>, vector<1x96xf32>
    %31 = vector.broadcast %30 : vector<1x96xf32> to vector<16x96xf32>
    %32 = arith.addf %29, %31 : vector<16x96xf32>
    %33 = vector.extract_strided_slice %32 {offsets = [0, 0], sizes = [16, 32], strides = [1, 1]} : vector<16x96xf32> to vector<16x32xf32>
    %34 = vector.extract_strided_slice %32 {offsets = [0, 32], sizes = [16, 32], strides = [1, 1]} : vector<16x96xf32> to vector<16x32xf32>
    %35 = vector.extract_strided_slice %32 {offsets = [0, 64], sizes = [16, 32], strides = [1, 1]} : vector<16x96xf32> to vector<16x32xf32>
    %cst_19 = arith.constant 0.000000e+00 : f32
    %36 = vector.broadcast %cst_19 : f32 to vector<16x32xf32>
    %c6 = arith.constant 6 : index
    %c0_20 = arith.constant 0 : index
    %37 = vector.load %arg8[%c6, %c0_20] : memref<10x32xf32, #tpu.memory_space<vmem>>, vector<1x32xf32>
    %38 = vector.broadcast %37 : vector<1x32xf32> to vector<16x32xf32>
    %39 = arith.mulf %34, %38 : vector<16x32xf32>
    %40 = vector.broadcast %37 : vector<1x32xf32> to vector<16x32xf32>
    %41 = arith.mulf %35, %40 : vector<16x32xf32>
    %42 = tpu.transpose %39, [1, 0] : vector<16x32xf32> -> vector<32x16xf32>
    %cst_21 = arith.constant dense<0.000000e+00> : vector<16x16xf32>
    %43 = tpu.matmul %33, %42, %cst_21 {dimension_numbers = #tpu.dot_dimension_numbers<[1], [0], [0], [1], [0, 0, 1, 1], [], []>} : vector<16x32xf32>, vector<32x16xf32>, vector<16x16xf32> -> vector<16x16xf32>
    %44 = arith.addf %43, %7 : vector<16x16xf32>
    %cst_22 = arith.constant dense<0xFF800000> : vector<16xf32>
    %45 = vector.multi_reduction <maximumf>, %44, %cst_22 [1] : vector<16x16xf32> to vector<16xf32>
    %46 = vector.shape_cast %45 : vector<16xf32> to vector<16x1xf32>
    %47 = vector.broadcast %46 : vector<16x1xf32> to vector<16x16xf32>
    %48 = arith.subf %44, %47 : vector<16x16xf32>
    %49 = math.exp %48 : vector<16x16xf32>
    %cst_23 = arith.constant dense<0.000000e+00> : vector<16xf32>
    %50 = vector.multi_reduction <add>, %49, %cst_23 [1] : vector<16x16xf32> to vector<16xf32>
    %51 = vector.shape_cast %50 : vector<16xf32> to vector<16x1xf32>
    %52 = tpu.reciprocal %51 {approx = true} : vector<16x1xf32> -> vector<16x1xf32>
    %53 = vector.broadcast %52 : vector<16x1xf32> to vector<16x16xf32>
    %54 = arith.mulf %49, %53 : vector<16x16xf32>
    %cst_24 = arith.constant dense<0.000000e+00> : vector<16x32xf32>
    %55 = tpu.matmul %54, %41, %cst_24 {dimension_numbers = #tpu.dot_dimension_numbers<[1], [0], [0], [1], [0, 0, 1, 1], [], []>} : vector<16x16xf32>, vector<16x32xf32>, vector<16x32xf32> -> vector<16x32xf32>
    %56 = arith.addf %36, %55 : vector<16x32xf32>
    %c7 = arith.constant 7 : index
    %c0_25 = arith.constant 0 : index
    %57 = vector.load %arg8[%c7, %c0_25] : memref<10x32xf32, #tpu.memory_space<vmem>>, vector<1x32xf32>
    %58 = vector.broadcast %57 : vector<1x32xf32> to vector<16x32xf32>
    %59 = arith.mulf %34, %58 : vector<16x32xf32>
    %60 = vector.broadcast %57 : vector<1x32xf32> to vector<16x32xf32>
    %61 = arith.mulf %35, %60 : vector<16x32xf32>
    %62 = tpu.transpose %59, [1, 0] : vector<16x32xf32> -> vector<32x16xf32>
    %cst_26 = arith.constant dense<0.000000e+00> : vector<16x16xf32>
    %63 = tpu.matmul %33, %62, %cst_26 {dimension_numbers = #tpu.dot_dimension_numbers<[1], [0], [0], [1], [0, 0, 1, 1], [], []>} : vector<16x32xf32>, vector<32x16xf32>, vector<16x16xf32> -> vector<16x16xf32>
    %64 = arith.addf %63, %7 : vector<16x16xf32>
    %cst_27 = arith.constant dense<0xFF800000> : vector<16xf32>
    %65 = vector.multi_reduction <maximumf>, %64, %cst_27 [1] : vector<16x16xf32> to vector<16xf32>
    %66 = vector.shape_cast %65 : vector<16xf32> to vector<16x1xf32>
    %67 = vector.broadcast %66 : vector<16x1xf32> to vector<16x16xf32>
    %68 = arith.subf %64, %67 : vector<16x16xf32>
    %69 = math.exp %68 : vector<16x16xf32>
    %cst_28 = arith.constant dense<0.000000e+00> : vector<16xf32>
    %70 = vector.multi_reduction <add>, %69, %cst_28 [1] : vector<16x16xf32> to vector<16xf32>
    %71 = vector.shape_cast %70 : vector<16xf32> to vector<16x1xf32>
    %72 = tpu.reciprocal %71 {approx = true} : vector<16x1xf32> -> vector<16x1xf32>
    %73 = vector.broadcast %72 : vector<16x1xf32> to vector<16x16xf32>
    %74 = arith.mulf %69, %73 : vector<16x16xf32>
    %cst_29 = arith.constant dense<0.000000e+00> : vector<16x32xf32>
    %75 = tpu.matmul %74, %61, %cst_29 {dimension_numbers = #tpu.dot_dimension_numbers<[1], [0], [0], [1], [0, 0, 1, 1], [], []>} : vector<16x16xf32>, vector<16x32xf32>, vector<16x32xf32> -> vector<16x32xf32>
    %76 = arith.addf %56, %75 : vector<16x32xf32>
    %c8 = arith.constant 8 : index
    %c0_30 = arith.constant 0 : index
    %77 = vector.load %arg8[%c8, %c0_30] : memref<10x32xf32, #tpu.memory_space<vmem>>, vector<1x32xf32>
    %78 = vector.broadcast %77 : vector<1x32xf32> to vector<16x32xf32>
    %79 = arith.mulf %34, %78 : vector<16x32xf32>
    %80 = vector.broadcast %77 : vector<1x32xf32> to vector<16x32xf32>
    %81 = arith.mulf %35, %80 : vector<16x32xf32>
    %82 = tpu.transpose %79, [1, 0] : vector<16x32xf32> -> vector<32x16xf32>
    %cst_31 = arith.constant dense<0.000000e+00> : vector<16x16xf32>
    %83 = tpu.matmul %33, %82, %cst_31 {dimension_numbers = #tpu.dot_dimension_numbers<[1], [0], [0], [1], [0, 0, 1, 1], [], []>} : vector<16x32xf32>, vector<32x16xf32>, vector<16x16xf32> -> vector<16x16xf32>
    %84 = arith.addf %83, %7 : vector<16x16xf32>
    %cst_32 = arith.constant dense<0xFF800000> : vector<16xf32>
    %85 = vector.multi_reduction <maximumf>, %84, %cst_32 [1] : vector<16x16xf32> to vector<16xf32>
    %86 = vector.shape_cast %85 : vector<16xf32> to vector<16x1xf32>
    %87 = vector.broadcast %86 : vector<16x1xf32> to vector<16x16xf32>
    %88 = arith.subf %84, %87 : vector<16x16xf32>
    %89 = math.exp %88 : vector<16x16xf32>
    %cst_33 = arith.constant dense<0.000000e+00> : vector<16xf32>
    %90 = vector.multi_reduction <add>, %89, %cst_33 [1] : vector<16x16xf32> to vector<16xf32>
    %91 = vector.shape_cast %90 : vector<16xf32> to vector<16x1xf32>
    %92 = tpu.reciprocal %91 {approx = true} : vector<16x1xf32> -> vector<16x1xf32>
    %93 = vector.broadcast %92 : vector<16x1xf32> to vector<16x16xf32>
    %94 = arith.mulf %89, %93 : vector<16x16xf32>
    %cst_34 = arith.constant dense<0.000000e+00> : vector<16x32xf32>
    %95 = tpu.matmul %94, %81, %cst_34 {dimension_numbers = #tpu.dot_dimension_numbers<[1], [0], [0], [1], [0, 0, 1, 1], [], []>} : vector<16x16xf32>, vector<16x32xf32>, vector<16x32xf32> -> vector<16x32xf32>
    %96 = arith.addf %76, %95 : vector<16x32xf32>
    %c9 = arith.constant 9 : index
    %c0_35 = arith.constant 0 : index
    %97 = vector.load %arg8[%c9, %c0_35] : memref<10x32xf32, #tpu.memory_space<vmem>>, vector<1x32xf32>
    %98 = vector.broadcast %97 : vector<1x32xf32> to vector<16x32xf32>
    %99 = arith.mulf %34, %98 : vector<16x32xf32>
    %100 = vector.broadcast %97 : vector<1x32xf32> to vector<16x32xf32>
    %101 = arith.mulf %35, %100 : vector<16x32xf32>
    %102 = tpu.transpose %99, [1, 0] : vector<16x32xf32> -> vector<32x16xf32>
    %cst_36 = arith.constant dense<0.000000e+00> : vector<16x16xf32>
    %103 = tpu.matmul %33, %102, %cst_36 {dimension_numbers = #tpu.dot_dimension_numbers<[1], [0], [0], [1], [0, 0, 1, 1], [], []>} : vector<16x32xf32>, vector<32x16xf32>, vector<16x16xf32> -> vector<16x16xf32>
    %104 = arith.addf %103, %7 : vector<16x16xf32>
    %cst_37 = arith.constant dense<0xFF800000> : vector<16xf32>
    %105 = vector.multi_reduction <maximumf>, %104, %cst_37 [1] : vector<16x16xf32> to vector<16xf32>
    %106 = vector.shape_cast %105 : vector<16xf32> to vector<16x1xf32>
    %107 = vector.broadcast %106 : vector<16x1xf32> to vector<16x16xf32>
    %108 = arith.subf %104, %107 : vector<16x16xf32>
    %109 = math.exp %108 : vector<16x16xf32>
    %cst_38 = arith.constant dense<0.000000e+00> : vector<16xf32>
    %110 = vector.multi_reduction <add>, %109, %cst_38 [1] : vector<16x16xf32> to vector<16xf32>
    %111 = vector.shape_cast %110 : vector<16xf32> to vector<16x1xf32>
    %112 = tpu.reciprocal %111 {approx = true} : vector<16x1xf32> -> vector<16x1xf32>
    %113 = vector.broadcast %112 : vector<16x1xf32> to vector<16x16xf32>
    %114 = arith.mulf %109, %113 : vector<16x16xf32>
    %cst_39 = arith.constant dense<0.000000e+00> : vector<16x32xf32>
    %115 = tpu.matmul %114, %101, %cst_39 {dimension_numbers = #tpu.dot_dimension_numbers<[1], [0], [0], [1], [0, 0, 1, 1], [], []>} : vector<16x16xf32>, vector<16x32xf32>, vector<16x32xf32> -> vector<16x32xf32>
    %116 = arith.addf %96, %115 : vector<16x32xf32>
    %c0_40 = arith.constant 0 : index
    %c0_41 = arith.constant 0 : index
    %117 = vector.load %arg4[%c0_40, %c0_41] : memref<32x32xf32, #tpu.memory_space<vmem>>, vector<32x32xf32>
    %cst_42 = arith.constant dense<0.000000e+00> : vector<16x32xf32>
    %118 = tpu.matmul %116, %117, %cst_42 {dimension_numbers = #tpu.dot_dimension_numbers<[1], [0], [0], [1], [0, 0, 1, 1], [], []>} : vector<16x32xf32>, vector<32x32xf32>, vector<16x32xf32> -> vector<16x32xf32>
    %119 = vector.broadcast %5 : vector<1x32xf32> to vector<16x32xf32>
    %120 = arith.addf %118, %119 : vector<16x32xf32>
    %121 = arith.addf %0, %120 : vector<16x32xf32>
    %cst_43 = arith.constant dense<0.000000e+00> : vector<16xf32>
    %122 = vector.multi_reduction <add>, %121, %cst_43 [1] : vector<16x32xf32> to vector<16xf32>
    %123 = vector.shape_cast %122 : vector<16xf32> to vector<16x1xf32>
    %cst_44 = arith.constant 3.200000e+01 : f32
    %124 = vector.broadcast %cst_44 : f32 to vector<16x1xf32>
    %125 = arith.divf %123, %124 : vector<16x1xf32>
    %126 = vector.broadcast %125 : vector<16x1xf32> to vector<16x32xf32>
    %127 = arith.subf %121, %126 : vector<16x32xf32>
    %128 = arith.mulf %127, %127 : vector<16x32xf32>
    %cst_45 = arith.constant dense<0.000000e+00> : vector<16xf32>
    %129 = vector.multi_reduction <add>, %128, %cst_45 [1] : vector<16x32xf32> to vector<16xf32>
    %130 = vector.shape_cast %129 : vector<16xf32> to vector<16x1xf32>
    %cst_46 = arith.constant 3.200000e+01 : f32
    %131 = vector.broadcast %cst_46 : f32 to vector<16x1xf32>
    %132 = arith.divf %130, %131 : vector<16x1xf32>
    %cst_47 = arith.constant 9.99999974E-6 : f32
    %133 = vector.broadcast %cst_47 : f32 to vector<16x1xf32>
    %134 = arith.addf %132, %133 : vector<16x1xf32>
    %135 = math.rsqrt %134 : vector<16x1xf32>
    %136 = vector.broadcast %135 : vector<16x1xf32> to vector<16x32xf32>
    %137 = arith.mulf %127, %136 : vector<16x32xf32>
    %138 = vector.broadcast %3 : vector<1x32xf32> to vector<16x32xf32>
    %139 = arith.mulf %137, %138 : vector<16x32xf32>
    %140 = vector.broadcast %4 : vector<1x32xf32> to vector<16x32xf32>
    %141 = arith.addf %139, %140 : vector<16x32xf32>
    %c0_48 = arith.constant 0 : index
    %c0_49 = arith.constant 0 : index
    %142 = vector.load %arg5[%c0_48, %c0_49] : memref<32x128xf32, #tpu.memory_space<vmem>>, vector<32x128xf32>
    %cst_50 = arith.constant dense<0.000000e+00> : vector<16x128xf32>
    %143 = tpu.matmul %141, %142, %cst_50 {dimension_numbers = #tpu.dot_dimension_numbers<[1], [0], [0], [1], [0, 0, 1, 1], [], []>} : vector<16x32xf32>, vector<32x128xf32>, vector<16x128xf32> -> vector<16x128xf32>
    %c0_51 = arith.constant 0 : index
    %c0_52 = arith.constant 0 : index
    %144 = vector.load %arg6[%c0_51, %c0_52] : memref<1x128xf32, #tpu.memory_space<vmem>>, vector<1x128xf32>
    %145 = vector.broadcast %144 : vector<1x128xf32> to vector<16x128xf32>
    %146 = arith.addf %143, %145 : vector<16x128xf32>
    %147 = arith.mulf %146, %146 : vector<16x128xf32>
    %148 = arith.mulf %146, %147 : vector<16x128xf32>
    %cst_53 = arith.constant 4.471500e-02 : f32
    %149 = vector.broadcast %cst_53 : f32 to vector<16x128xf32>
    %150 = arith.mulf %149, %148 : vector<16x128xf32>
    %151 = arith.addf %146, %150 : vector<16x128xf32>
    %cst_54 = arith.constant 0.797884583 : f32
    %152 = vector.broadcast %cst_54 : f32 to vector<16x128xf32>
    %153 = arith.mulf %152, %151 : vector<16x128xf32>
    %154 = math.tanh %153 : vector<16x128xf32>
    %cst_55 = arith.constant 1.000000e+00 : f32
    %155 = vector.broadcast %cst_55 : f32 to vector<16x128xf32>
    %156 = arith.addf %155, %154 : vector<16x128xf32>
    %cst_56 = arith.constant 5.000000e-01 : f32
    %157 = vector.broadcast %cst_56 : f32 to vector<16x128xf32>
    %158 = arith.mulf %157, %156 : vector<16x128xf32>
    %159 = arith.mulf %146, %158 : vector<16x128xf32>
    %c0_57 = arith.constant 0 : index
    %c0_58 = arith.constant 0 : index
    %160 = vector.load %arg7[%c0_57, %c0_58] : memref<128x32xf32, #tpu.memory_space<vmem>>, vector<128x32xf32>
    %cst_59 = arith.constant dense<0.000000e+00> : vector<16x32xf32>
    %161 = tpu.matmul %159, %160, %cst_59 {dimension_numbers = #tpu.dot_dimension_numbers<[1], [0], [0], [1], [0, 0, 1, 1], [], []>} : vector<16x128xf32>, vector<128x32xf32>, vector<16x32xf32> -> vector<16x32xf32>
    %162 = vector.broadcast %6 : vector<1x32xf32> to vector<16x32xf32>
    %163 = arith.addf %161, %162 : vector<16x32xf32>
    %164 = arith.addf %121, %163 : vector<16x32xf32>
    %c0_60 = arith.constant 0 : index
    %c0_61 = arith.constant 0 : index
    %165 = vector.load %arg10[%c0_60, %c0_61] : memref<16x32xf32, #tpu.memory_space<vmem>>, vector<16x32xf32>
    tpu.vector_store %arg10[%c0_60, %c0_61], %164 {strides = array<i32>} : memref<16x32xf32, #tpu.memory_space<vmem>>, vector<16x32xf32>,
    return
  }
  func.func @transform_0(%arg0: i32) -> (i32, i32) {
    %c0_i32 = arith.constant 0 : i32
    %c0_i32_0 = arith.constant 0 : i32
    %c0_i32_1 = arith.constant 0 : i32
    return %c0_i32, %c0_i32_0 : i32, i32
  }
  func.func @transform_1(%arg0: i32) -> (i32, i32) {
    %c0_i32 = arith.constant 0 : i32
    %c0_i32_0 = arith.constant 0 : i32
    %c0_i32_1 = arith.constant 0 : i32
    return %c0_i32, %c0_i32_0 : i32, i32
  }
  func.func @transform_2(%arg0: i32) -> (i32, i32) {
    %c0_i32 = arith.constant 0 : i32
    %c0_i32_0 = arith.constant 0 : i32
    %c0_i32_1 = arith.constant 0 : i32
    return %c0_i32, %c0_i32_0 : i32, i32
  }
  func.func @transform_3(%arg0: i32) -> (i32, i32) {
    %c0_i32 = arith.constant 0 : i32
    %c0_i32_0 = arith.constant 0 : i32
    %c0_i32_1 = arith.constant 0 : i32
    return %c0_i32, %c0_i32_0 : i32, i32
  }
  func.func @transform_4(%arg0: i32) -> (i32, i32) {
    %c0_i32 = arith.constant 0 : i32
    %c0_i32_0 = arith.constant 0 : i32
    %c0_i32_1 = arith.constant 0 : i32
    return %c0_i32, %c0_i32_0 : i32, i32
  }
  func.func @transform_5(%arg0: i32) -> (i32, i32) {
    %c0_i32 = arith.constant 0 : i32
    %c0_i32_0 = arith.constant 0 : i32
    %c0_i32_1 = arith.constant 0 : i32
    return %c0_i32, %c0_i32_0 : i32, i32
  }
  func.func @transform_6(%arg0: i32) -> (i32, i32) {
    %c0_i32 = arith.constant 0 : i32
    %c0_i32_0 = arith.constant 0 : i32
    %c0_i32_1 = arith.constant 0 : i32
    return %c0_i32, %c0_i32_0 : i32, i32
  }
  func.func @transform_7(%arg0: i32) -> (i32, i32) {
    %c0_i32 = arith.constant 0 : i32
    %c0_i32_0 = arith.constant 0 : i32
    %c0_i32_1 = arith.constant 0 : i32
    return %c0_i32, %c0_i32_0 : i32, i32
  }
  func.func @transform_8(%arg0: i32) -> (i32, i32) {
    %c0_i32 = arith.constant 0 : i32
    %c0_i32_0 = arith.constant 0 : i32
    %c0_i32_1 = arith.constant 0 : i32
    return %c0_i32, %c0_i32_0 : i32, i32
  }
  func.func @transform_9(%arg0: i32) -> (i32, i32) {
    %c0_i32 = arith.constant 0 : i32
    %c0_i32_0 = arith.constant 0 : i32
    %c0_i32_1 = arith.constant 0 : i32
    return %c0_i32, %c0_i32_0 : i32, i32
  }
}

</mosaic_0001>

<bundles_post_ra>
// kernel: tpu_custom_call.1
= control target key start
LH: loop header
LB: loop body
LE: loop exit
PB: predicated region body
PF: predicated region fallthrough
CT: control target
= control target key end

     0   :  { %vm43_vm0 = vcmask 261120   ;;  %s2202_s0 = inlined_call_operand.vmem [shape: f32[16,32], index: 0, kind: input, shape index: {}]   ;;  %s2203_s1 = inlined_call_operand.vmem [shape: f32[32,96], index: 1, kind: input, shape index: {}]   ;;  %s2204_s2 = inlined_call_operand.vmem [shape: f32[1,96], index: 2, kind: input, shape index: {}]   ;;  %s2205_s3 = inlined_call_operand.vmem [shape: f32[32,32], index: 3, kind: input, shape index: {}]   ;;  %s2206_s4 = inlined_call_operand.vmem [shape: f32[32,128], index: 4, kind: input, shape index: {}]   ;;  %s2207_s5 = inlined_call_operand.vmem [shape: f32[1,128], index: 5, kind: input, shape index: {}]   ;;  %s2208_s6 = inlined_call_operand.vmem [shape: f32[128,32], index: 6, kind: input, shape index: {}]   ;;  %s2209_s7 = inlined_call_operand.vmem [shape: f32[10,32], index: 7, kind: input, shape index: {}]   ;;  %s2210_s8 = inlined_call_operand.vmem [shape: f32[16,16], index: 8, kind: input, shape index: {}]   ;;  %s2211_s9 = inlined_call_operand.hbm [shape: f32[16,32], index: 9, kind: output, shape index: {}]  }
   0x1   :  { %v1897_v0 = vld [vmem:[%s2202_s0] sm:$0xff]  ;;  %v1902_v1 = vld [vmem:[%s2202_s0 + $0x8] sm:$0xff] }
   0x2   :  { %14 = vsyncpa [#allocation3], 0  ;;  %v44_v2 = vsel %vm43_vm0, %v1897_v0, 0.0  ;;  %v47_v3 = vsel %vm43_vm0, %v1902_v1, 0.0  ;;  %v83_v14 = vld [vmem:[%s2203_s1] sm:$0xff]  ;;  %v84_v15 = vld [vmem:[%s2203_s1 + $0x8] sm:$0xff] }
   0x3   :  { %45 = vadd.xlane.f32.xlu0 %v44_v2  ;;  %v85_v16 = vld [vmem:[%s2203_s1 + $0x10] sm:$0xff]  ;;  %v1622_v17 = vpack.c.bf16 %v84_v15, %v83_v14  ;;  %v86_v18 = vld [vmem:[%s2203_s1 + $0x18] sm:$0xff]  ;;  %v1927_v20 = vld [vmem:[%s2209_s7 + $0x6] ss:$0 sm:$0xff]  ;;  %s1838_s24 = smov 32   ;;  %vm282_vm2 = vcmask 130048  }
   0x4   :  { %v1626_v19 = vpack.c.bf16 %v86_v18, %v85_v16  ;;  %v1932_v21 = vld [vmem:[%s2209_s7 + $0x7] ss:$0 sm:$0xff]  ;;  %v1388_v29 = vld [vmem:[%s2209_s7] ss:$0 sm:$0xff]  ;;  %v1389_v31 = vld [vmem:[%s2209_s7 + $0x1] ss:$0 sm:$0xff] }
   0x5   :  { %1623 = vmatprep.subr.bf16.mxu0 %v1622_v17  ;;  %v1390_v38 = vld [vmem:[%s2204_s2] ss:$0 sm:$0xff]  ;;  %s1839_s2 = smov 96   ;;  %vm1963_vm1 = vmpackc.low %vm43_vm0, %vm43_vm0  ;;  %v1984_v62 = vld [vmem:[%s2210_s8 + $0x8] sm:$0xff]  ;;  %s1841_s18 = smov [#allocation2]  }
   0x6   :  { %1625 = vmatpush3.bf16.msra.mxu0 %v1622_v17  ;;  %v1989_v2 = vld [vmem:[%s2210_s8] sm:$0xff]  ;;  %s1840_s8 = smov 64   ;;  %s1377_s19 = sshll.u32 %s1841_s18, 4  ;;  %s1378_s19 = int_to_ptr.vmem [resolvable:$true] %s1377_s19 }
   0x7   :  { %48 = vadd.xlane.f32.xlu0 %v47_v3  ;;  %1627 = vmatprep.subr.bf16.mxu0 %v1626_v19  ;;  %s1814_s20 = scalar_lea.vmem %s1378_s19, 256  ;;  %p1819_p1 = scmp.lt.s32.totalorder %s1378_s19, %s1378_s19 }
   0x8   :  { %p1815_p0 = scmp.ne.s32.totalorder %s1378_s19, %s1814_s20  ;;  %p1820_p2 = scmp.lt.s32.totalorder %s1814_s20, %s1814_s20 }
   0xa   :  { %1629 = vmatpush3.bf16.msra.mxu0 %v1626_v19  ;;  %p1821_p3 = por %p1820_p2, %p1819_p1 }
   0xc   :  { %p1822_p4 = pnand %p1821_p3, %p1815_p0 }
  0x1d   :  { %181 = vrot.lane.b32.xlu0 %v1927_v20, %s1838_s24 }
  0x90   :  { %v46_v4 = vpop.xlane.xlu0 %45 }
  0x91   :  { %v51_v5 = vmul.f32 0.03125, %v46_v4 }
  0x93   :  { %v53_v6 = vsub.f32 %v1897_v0, %v51_v5 }
  0x94   :  { %v49_v7 = vpop.xlane.xlu0 %48 }
  0x95   :  { %v52_v8 = vmul.f32 0.03125, %v49_v7  ;;  %v55_v9 = vmul.f32 %v53_v6, %v53_v6 }
  0x97   :  { %v54_v10 = vsub.f32 %v1902_v1, %v52_v8  ;;  %v57_v11 = vsel %vm43_vm0, %v55_v9, 0.0  ;;  %v1407_v8 = vld [vmem:[%s2209_s7 + $0x8] ss:$0 sm:$0xff] }
  0x98   :  { %58 = vadd.xlane.f32.xlu1 %v57_v11  ;;  %v182_v40 = vpop.permute.xlu0 %181 }
  0x99   :  { %v56_v12 = vmul.f32 %v54_v10, %v54_v10 }
  0x9b   :  { %v60_v13 = vsel %vm43_vm0, %v56_v12, 0.0 }
  0x9c   :  { %61 = vadd.xlane.f32.xlu1 %v60_v13 }
  0xad   :  { %311 = vrot.lane.b32.xlu1 %v1932_v21, %s1838_s24 }
 0x125   :  { %v59_v22 = vpop.xlane.xlu1 %58 }
 0x126   :  { %v63_v23 = vmul.f32 0.03125, %v59_v22 }
 0x128   :  { %v65_v24 = vadd.f32 1e-05, %v63_v23 }
 0x129   :  { %v62_v25 = vpop.xlane.xlu1 %61 }
 0x12a   :  { %1770 = vrsqrt.f32 %v65_v24  ;;  %v64_v26 = vmul.f32 0.03125, %v62_v25 }
 0x12c   :  { %v66_v27 = vadd.f32 1e-05, %v64_v26 }
 0x12d   :  { %v312_v44 = vpop.permute.xlu1 %311 }
 0x12e   :  { %1772 = vrsqrt.f32 %v66_v27 }
 0x134   :  { %v1771_v28 = vpop.eup %1770 }
 0x135   :  { %v69_v30 = vmul.f32 %v1771_v28, %v53_v6 }
 0x137   :  { %v75_v32 = vmul.f32 %v1388_v29, %v69_v30 }
 0x138   :  { %v1773_v33 = vpop.eup %1772 }
 0x139   :  { %v70_v34 = vmul.f32 %v1773_v33, %v54_v10  ;;  %v81_v35 = vadd.f32 %v1389_v31, %v75_v32  ;;  %v2017_v32 = vld [vmem:[%s2209_s7 + $0x9] ss:$0 sm:$0xff] }
 0x13b   :  { %v76_v36 = vmul.f32 %v1388_v29, %v70_v34  ;;  %1506 = vmatprep.mubr.msk.f32.mxu0 %vm43_vm0, %v81_v35 }
 0x13d   :  { %v82_v37 = vadd.f32 %v1389_v31, %v76_v36 }
 0x13f   :  { %1507 = vmatmul.mubr.msk.f32.vlgmr.msra.gmra.mrb[0].mxu0 %vm43_vm0, %v82_v37 }
 0x212   :  { %v1508_v39 = vpop.f32.mrb[0].mxu0 }
 0x213   :  { %v1949_v41 = vadd.f32 %v1508_v39, %v1390_v38  ;;  %v166_v42 = vpop.f32.mrb[1].mxu0 }
 0x214   :  { %v1951_v43 = vadd.f32 %v1390_v38, %v166_v42 }
 0x215   :  { %v185_v45 = vmul.f32 %v182_v40, %v1949_v41  ;;  %v315_v48 = vmul.f32 %v312_v44, %v1949_v41 }
 0x216   :  { %v184_v46 = vmul.f32 %v182_v40, %v1951_v43  ;;  %1513 = vmatprep.mubr.msk.f32.mxu0 %vm43_vm0, %v1951_v43  ;;  %v314_v47 = vmul.f32 %v312_v44, %v1951_v43 }
 0x218   :  { %v1730_v49 = vpack.i.bf16 %v185_v45, %v184_v46  ;;  %v1735_v50 = vpack.i.bf16 %v315_v48, %v314_v47 }
 0x21a   :  { %1731 = vrot.lane.b32.xlu1 %v1730_v49, %s1839_s2 }
 0x21e   :  { %1736 = vrot.lane.b32.xlu1 %v1735_v50, %s1839_s2 }
 0x28c   :  { %v1732_v51 = vpop.permute.xlu1 %1731 }
 0x28d   :  { %v1734_v52 = vunpack.i.h.bf16 %v1732_v51  ;;  %v1733_v53 = vunpack.i.l.bf16 %v1732_v51 }
 0x28f   :  { %v1630_v55 = vpack.c.bf16 %v1734_v52, %v1733_v53 }
 0x290   :  { %v1737_v56 = vpop.permute.xlu1 %1736 }
 0x291   :  { %v1739_v57 = vunpack.i.h.bf16 %v1737_v56  ;;  %v1738_v58 = vunpack.i.l.bf16 %v1737_v56  ;;  %1632 = vmatprep.subr.msk.bf16.mxu0 %vm1963_vm1, %v1630_v55 }
 0x292   :  { %1635 = vmatpush3.bf16.xpose.msk.msra.mxu0 %vm1963_vm1, %v1630_v55 }
 0x293   :  { %v1636_v59 = vpack.c.bf16 %v1739_v57, %v1738_v58 }
 0x295   :  { %1638 = vmatprep.subr.msk.bf16.mxu0 %vm1963_vm1, %v1636_v59 }
 0x299   :  { %1514 = vmatmul.mubr.msk.f32.vlgmr.msra.gmra.mrb[2].mxu0 %vm43_vm0, %v1949_v41 }
 0x29a   :  { %1641 = vmatpush3.bf16.xpose.msk.msra.mxu0 %vm1963_vm1, %v1636_v59  ;;  %1520 = vmatprep.mubr.msk.f32.mxu0 %vm43_vm0, %v1951_v43 }
 0x2a1   :  { %1521 = vmatmul.mubr.msk.f32.vlgmr.msra.gmra.mrb[4].mxu0 %vm43_vm0, %v1949_v41 }
 0x36c   :  { %v1515_v60 = vpop.f32.mrb[2].mxu0 }
 0x36d   :  { %v273_v61 = vpop.f32.mrb[3].mxu0  ;;  %v279_v28 = vadd.f32 %v1515_v60, %v1984_v62 }
 0x36e   :  { %v274_v29 = vadd.f32 %v273_v61, %v1989_v2 }
 0x36f   :  { %v286_v30 = vsel %vm282_vm2, %v279_v28, -inf }
 0x370   :  { %v283_v31 = vsel %vm282_vm2, %v274_v29, -inf }
 0x374   :  { %v1522_v63 = vpop.f32.mrb[4].mxu0 }
 0x375   :  { %v403_v3 = vadd.f32 %v1522_v63, %v1984_v62  ;;  %v397_v4 = vpop.f32.mrb[5].mxu0 }
 0x376   :  { %v398_v5 = vadd.f32 %v397_v4, %v1989_v2 }
 0x377   :  { %v409_v6 = vsel %vm282_vm2, %v403_v3, -inf }
 0x378   :  { %410 = vmax.xlane.f32.xlu1 %v409_v6  ;;  %v406_v7 = vsel %vm282_vm2, %v398_v5, -inf }
 0x379   :  { %407 = vmax.xlane.f32.xlu0 %v406_v7 }
 0x389   :  { %612 = vrot.lane.b32.xlu1 %v1407_v8, %s1838_s24 }
 0x38f   :  { %316 = vrot.lane.b32.xlu0 %v1932_v21, %s1840_s8 }
 0x405   :  { %v411_v9 = vpop.xlane.xlu1 %410 }
 0x406   :  { %v413_v10 = vsub.f32 %v403_v3, %v411_v9  ;;  %v408_v11 = vpop.xlane.xlu0 %407 }
 0x407   :  { %v412_v12 = vsub.f32 %v398_v5, %v408_v11 }
 0x408   :  { %v416_v13 = vmul.f32 1.442695, %v413_v10 }
 0x409   :  { %v414_v14 = vmul.f32 1.442695, %v412_v12  ;;  %v613_v19 = vpop.permute.xlu1 %612 }
 0x40a   :  { %1774 = vpow2.f32 %v416_v13  ;;  %v615_v22 = vmul.f32 %v613_v19, %v1951_v43  ;;  %v616_v21 = vmul.f32 %v613_v19, %v1949_v41  ;;  %v317_v23 = vpop.permute.xlu0 %316 }
 0x40b   :  { %1776 = vpow2.f32 %v414_v14  ;;  %v319_v25 = vmul.f32 %v317_v23, %v1951_v43  ;;  %v320_v26 = vmul.f32 %v317_v23, %v1949_v41 }
 0x40c   :  { %v1745_v24 = vpack.i.bf16 %v616_v21, %v615_v22 }
 0x40d   :  { %v1740_v27 = vpack.i.bf16 %v320_v26, %v319_v25 }
 0x414   :  { %v1775_v15 = vpop.eup %1774 }
 0x415   :  { %v1777_v16 = vpop.eup %1776  ;;  %v421_v17 = vsel %vm282_vm2, %v1775_v15, 0.0 }
 0x416   :  { %422 = vadd.xlane.f32.xlu1 %v421_v17  ;;  %v418_v18 = vsel %vm282_vm2, %v1777_v16, 0.0 }
 0x417   :  { %419 = vadd.xlane.f32.xlu0 %v418_v18 }
 0x427   :  { %1746 = vrot.lane.b32.xlu1 %v1745_v24, %s1839_s2 }
 0x42d   :  { %1741 = vrot.lane.b32.xlu0 %v1740_v27, %s1840_s8 }
 0x44b   :  { %287 = vmax.xlane.f32.xlu1 %v286_v30 }
 0x44c   :  { %284 = vmax.xlane.f32.xlu0 %v283_v31 }
 0x45c   :  { %617 = vrot.lane.b32.xlu1 %v1407_v8, %s1840_s8 }
 0x460   :  { %826 = vrot.lane.b32.xlu1 %v2017_v32, %s1838_s24 }
 0x4a3   :  { %v423_v33 = vpop.xlane.xlu1 %422 }
 0x4a4   :  { %1778 = vrcp.f32 %v423_v33  ;;  %v420_v34 = vpop.xlane.xlu0 %419 }
 0x4a5   :  { %1780 = vrcp.f32 %v420_v34 }
 0x4a7   :  { %v1747_v35 = vpop.permute.xlu1 %1746 }
 0x4a8   :  { %v1742_v36 = vpop.permute.xlu0 %1741  ;;  %v1749_v37 = vunpack.i.h.bf16 %v1747_v35  ;;  %v1748_v38 = vunpack.i.l.bf16 %v1747_v35 }
 0x4a9   :  { %v1744_v39 = vunpack.i.h.bf16 %v1742_v36  ;;  %v1743_v40 = vunpack.i.l.bf16 %v1742_v36 }
 0x4aa   :  { %v1650_v44 = vpack.c.bf16 %v1749_v37, %v1748_v38 }
 0x4ab   :  { %v1642_v42 = vpack.c.bf16 %v1744_v39, %v1743_v40 }
 0x4ad   :  { %1643 = vmatprep.subr.bf16.mxu0 %v1642_v42 }
 0x4ae   :  { %v1779_v45 = vpop.eup %1778  ;;  %1645 = vmatpush3.bf16.msra.mxu0 %v1642_v42 }
 0x4af   :  { %v1781_v46 = vpop.eup %1780  ;;  %1652 = vmatprep.subr.msk.bf16.mxu0 %vm1963_vm1, %v1650_v44  ;;  %v427_v48 = vmul.f32 %v1779_v45, %v1775_v15 }
 0x4b0   :  { %v426_v47 = vmul.f32 %v1781_v46, %v1777_v16 }
 0x4b2   :  { %1527 = vmatprep.mubr.msk.f32.mxu0 %vm282_vm2, %v426_v47 }
 0x4b3   :  { %1528 = vmatmul.mubr.msk.f32.vlgmr.msra.gmra.mrb[6].mxu0 %vm282_vm2, %v427_v48 }
 0x4b4   :  { %1541 = vmatprep.mubr.msk.f32.mxu0 %vm43_vm0, %v1951_v43 }
 0x4b7   :  { %1655 = vmatpush3.bf16.xpose.msk.msra.mxu0 %vm1963_vm1, %v1650_v44 }
 0x4be   :  { %1542 = vmatmul.mubr.msk.f32.vlgmr.msra.gmra.mrb[8].mxu0 %vm43_vm0, %v1949_v41 }
 0x4d8   :  { %v288_v55 = vpop.xlane.xlu1 %287 }
 0x4d9   :  { %v285_v49 = vpop.xlane.xlu0 %284  ;;  %v290_v9 = vsub.f32 %v279_v28, %v288_v55 }
 0x4da   :  { %v289_v50 = vsub.f32 %v274_v29, %v285_v49 }
 0x4db   :  { %v293_v10 = vmul.f32 1.442695, %v290_v9 }
 0x4dc   :  { %v291_v51 = vmul.f32 1.442695, %v289_v50  ;;  %v618_v56 = vpop.permute.xlu1 %617 }
 0x4dd   :  { %v620_v30 = vmul.f32 %v618_v56, %v1951_v43  ;;  %v621_v31 = vmul.f32 %v618_v56, %v1949_v41 }
 0x4de   :  { %1782 = vpow2.f32 %v291_v51 }
 0x4df   :  { %v1755_v33 = vpack.i.bf16 %v621_v31, %v620_v30 }
 0x4e0   :  { %v827_v57 = vpop.permute.xlu1 %826 }
 0x4e1   :  { %v830_v23 = vmul.f32 %v827_v57, %v1949_v41 }
 0x4e8   :  { %v1783_v52 = vpop.eup %1782 }
 0x4e9   :  { %v295_v53 = vsel %vm282_vm2, %v1783_v52, 0.0 }
 0x4ea   :  { %296 = vadd.xlane.f32.xlu1 %v295_v53 }
 0x577   :  { %v297_v58 = vpop.xlane.xlu1 %296 }
 0x578   :  { %1784 = vrcp.f32 %v297_v58 }
 0x579   :  { %1786 = vpow2.f32 %v293_v10 }
 0x582   :  { %v1785_v59 = vpop.eup %1784 }
 0x583   :  { %v303_v60 = vmul.f32 %v1785_v59, %v1783_v52  ;;  %v1787_v11 = vpop.eup %1786 }
 0x584   :  { %v298_v12 = vsel %vm282_vm2, %v1787_v11, 0.0 }
 0x585   :  { %1534 = vmatprep.mubr.msk.f32.mxu1 %vm282_vm2, %v303_v60 }
 0x586   :  { %v2033_v61 = vpop.f32.mrb[6].mxu0 }
 0x587   :  { %v2035_v63 = vpop.f32.mrb[7].mxu0 }
 0x591   :  { %v1543_v3 = vpop.f32.mrb[8].mxu0 }
 0x592   :  { %v698_v4 = vpop.f32.mrb[9].mxu0  ;;  %v704_v6 = vadd.f32 %v1543_v3, %v1984_v62 }
 0x593   :  { %v699_v5 = vadd.f32 %v698_v4, %v1989_v2 }
 0x594   :  { %v710_v8 = vsel %vm282_vm2, %v704_v6, -inf }
 0x595   :  { %v707_v7 = vsel %vm282_vm2, %v699_v5, -inf }
 0x596   :  { %708 = vmax.xlane.f32.xlu0 %v707_v7 }
 0x59a   :  { %711 = vmax.xlane.f32.xlu0 %v710_v8 }
 0x5b0   :  { %186 = vrot.lane.b32.xlu0 %v1927_v20, %s1840_s8  ;;  %v829_v20 = vmul.f32 %v827_v57, %v1951_v43 }
 0x5b2   :  { %v1760_v25 = vpack.i.bf16 %v830_v23, %v829_v20 }
 0x5cf   :  { %299 = vadd.xlane.f32.xlu0 %v298_v12 }
 0x623   :  { %v709_v13 = vpop.xlane.xlu0 %708 }
 0x624   :  { %v713_v14 = vsub.f32 %v699_v5, %v709_v13 }
 0x626   :  { %v715_v17 = vmul.f32 1.442695, %v713_v14 }
 0x627   :  { %v712_v15 = vpop.xlane.xlu0 %711 }
 0x628   :  { %v714_v16 = vsub.f32 %v704_v6, %v712_v15 }
 0x62a   :  { %v717_v18 = vmul.f32 1.442695, %v714_v16  ;;  %v1034_v16 = vld [vmem:[%s2205_s3] sm:$0xff] }
 0x62b   :  { %v187_v19 = vpop.permute.xlu0 %186 }
 0x62c   :  { %1788 = vpow2.f32 %v717_v18  ;;  %v189_v22 = vmul.f32 %v187_v19, %v1951_v43  ;;  %v190_v21 = vmul.f32 %v187_v19, %v1949_v41 }
 0x62d   :  { %1790 = vpow2.f32 %v715_v17  ;;  %v1035_v17 = vld [vmem:[%s2205_s3 + $0x8] sm:$0xff] }
 0x62e   :  { %v1750_v24 = vpack.i.bf16 %v190_v21, %v189_v22  ;;  %v1670_v18 = vpack.c.bf16 %v1035_v17, %v1034_v16  ;;  %v1275_v16 = vld [vmem:[%s2208_s6 + $0x10] sm:$0xff]  ;;  %v1276_v17 = vld [vmem:[%s2208_s6 + $0x18] sm:$0xff] }
 0x630   :  { %1751 = vrot.lane.b32.xlu1 %v1750_v24, %s1840_s8  ;;  %1671 = vmatprep.subr.bf16.mxu0 %v1670_v18 }
 0x631   :  { %1673 = vmatpush3.bf16.msra.mxu0 %v1670_v18  ;;  %v1690_v18 = vpack.c.bf16 %v1276_v17, %v1275_v16 }
 0x634   :  { %1761 = vrot.lane.b32.xlu1 %v1760_v25, %s1839_s2 }
 0x636   :  { %v1789_v26 = vpop.eup %1788 }
 0x637   :  { %v722_v27 = vsel %vm282_vm2, %v1789_v26, 0.0  ;;  %v1791_v28 = vpop.eup %1790 }
 0x638   :  { %723 = vadd.xlane.f32.xlu0 %v722_v27  ;;  %v719_v29 = vsel %vm282_vm2, %v1791_v28, 0.0  ;;  %v1036_v27 = vld [vmem:[%s2205_s3 + $0x10] sm:$0xff] }
 0x63c   :  { %720 = vadd.xlane.f32.xlu0 %v719_v29 }
 0x652   :  { %1756 = vrot.lane.b32.xlu0 %v1755_v33, %s1840_s8 }
 0x65c   :  { %v300_v34 = vpop.xlane.xlu0 %299 }
 0x65d   :  { %1792 = vrcp.f32 %v300_v34 }
 0x667   :  { %v1793_v39 = vpop.eup %1792 }
 0x668   :  { %v304_v40 = vmul.f32 %v1793_v39, %v1787_v11 }
 0x6a2   :  { %v1752_v35 = vpop.permute.xlu1 %1751 }
 0x6a3   :  { %v1754_v36 = vunpack.i.h.bf16 %v1752_v35  ;;  %v1753_v37 = vunpack.i.l.bf16 %v1752_v35  ;;  %v1421_v35 = vld [vmem:[%s2209_s7 + $0x4] ss:$0 sm:$0xff] }
 0x6a5   :  { %v1646_v38 = vpack.c.bf16 %v1754_v36, %v1753_v37 }
 0x6a6   :  { %v1762_v45 = vpop.permute.xlu1 %1761 }
 0x6a7   :  { %1647 = vmatprep.subr.bf16.mxu1 %v1646_v38  ;;  %v1764_v47 = vunpack.i.h.bf16 %v1762_v45  ;;  %v1763_v48 = vunpack.i.l.bf16 %v1762_v45 }
 0x6a8   :  { %1649 = vmatpush3.bf16.msra.mxu1 %v1646_v38 }
 0x6a9   :  { %v1660_v52 = vpack.c.bf16 %v1764_v47, %v1763_v48 }
 0x6ab   :  { %1535 = vmatmul.mubr.msk.f32.vlgmr.msra.gmra.mrb[0].mxu1 %vm282_vm2, %v304_v40 }
 0x6c5   :  { %v724_v42 = vpop.xlane.xlu0 %723 }
 0x6c6   :  { %1794 = vrcp.f32 %v724_v42 }
 0x6c9   :  { %v721_v44 = vpop.xlane.xlu0 %720 }
 0x6ca   :  { %1796 = vrcp.f32 %v721_v44 }
 0x6cd   :  { %v1757_v46 = vpop.permute.xlu0 %1756 }
 0x6ce   :  { %v1759_v49 = vunpack.i.h.bf16 %v1757_v46  ;;  %v1758_v50 = vunpack.i.l.bf16 %v1757_v46 }
 0x6d0   :  { %v1656_v51 = vpack.c.bf16 %v1759_v49, %v1758_v50  ;;  %v1795_v53 = vpop.eup %1794 }
 0x6d1   :  { %v728_v57 = vmul.f32 %v1795_v53, %v1789_v26  ;;  %v1164_v53 = vld [vmem:[%s2206_s4 + $0x8] sm:$0xff] }
 0x6d2   :  { %1657 = vmatprep.subr.bf16.mxu1 %v1656_v51 }
 0x6d3   :  { %1659 = vmatpush3.bf16.msra.mxu1 %v1656_v51 }
 0x6d4   :  { %v1797_v55 = vpop.eup %1796  ;;  %1662 = vmatprep.subr.msk.bf16.mxu1 %vm1963_vm1, %v1660_v52 }
 0x6d5   :  { %v727_v56 = vmul.f32 %v1797_v55, %v1791_v28  ;;  %v1037_v28 = vld [vmem:[%s2205_s3 + $0x18] sm:$0xff] }
 0x6d6   :  { %v1674_v29 = vpack.c.bf16 %v1037_v28, %v1036_v27  ;;  %v1284_v27 = vld [vmem:[%s2208_s6 + $0x58] sm:$0xff] }
 0x6d7   :  { %1548 = vmatprep.mubr.msk.f32.mxu1 %vm282_vm2, %v727_v56  ;;  %v1165_v56 = vld [vmem:[%s2206_s4 + $0x10] sm:$0xff] }
 0x6d8   :  { %1549 = vmatmul.mubr.msk.f32.vlgmr.msra.gmra.mrb[0].mxu1 %vm282_vm2, %v728_v57  ;;  %1675 = vmatprep.subr.bf16.mxu0 %v1674_v29  ;;  %v1166_v57 = vld [vmem:[%s2206_s4 + $0x18] sm:$0xff] }
 0x6d9   :  { %1555 = vmatprep.mubr.msk.f32.mxu1 %vm43_vm0, %v1951_v43  ;;  %1677 = vmatpush3.bf16.msra.mxu0 %v1674_v29  ;;  %v1285_v29 = vld [vmem:[%s2208_s6 + $0x60] sm:$0xff] }
 0x6dc   :  { %1665 = vmatpush3.bf16.xpose.msk.msra.mxu1 %vm1963_vm1, %v1660_v52  ;;  %v1163_v52 = vld [vmem:[%s2206_s4] sm:$0xff] }
 0x6dd   :  { %v1678_v55 = vpack.c.bf16 %v1164_v53, %v1163_v52 }
 0x6df   :  { %1679 = vmatprep.subr.bf16.mxu0 %v1678_v55 }
 0x6e3   :  { %1556 = vmatmul.mubr.msk.f32.vlgmr.msra.gmra.mrb[2].mxu1 %vm43_vm0, %v1949_v41 }
 0x7b6   :  { %v1557_v58 = vpop.f32.mrb[2].mxu1 }
 0x7b7   :  { %v918_v59 = vadd.f32 %v1557_v58, %v1984_v62  ;;  %v912_v60 = vpop.f32.mrb[3].mxu1  ;;  %v1682_v58 = vpack.c.bf16 %v1166_v57, %v1165_v56 }
 0x7b8   :  { %v913_v3 = vadd.f32 %v912_v60, %v1989_v2 }
 0x7b9   :  { %v924_v4 = vsel %vm282_vm2, %v918_v59, -inf }
 0x7ba   :  { %925 = vmax.xlane.f32.xlu0 %v924_v4  ;;  %v921_v5 = vsel %vm282_vm2, %v913_v3, -inf }
 0x7bb   :  { %922 = vmax.xlane.f32.xlu1 %v921_v5 }
 0x7d0   :  { %831 = vrot.lane.b32.xlu0 %v2017_v32, %s1840_s8 }
 0x847   :  { %v926_v54 = vpop.xlane.xlu0 %925 }
 0x848   :  { %v928_v6 = vsub.f32 %v918_v59, %v926_v54  ;;  %v923_v7 = vpop.xlane.xlu1 %922 }
 0x849   :  { %v927_v8 = vsub.f32 %v913_v3, %v923_v7  ;;  %v1424_v7 = vld [vmem:[%s2209_s7 + $0x2] ss:$0 sm:$0xff] }
 0x84a   :  { %v931_v9 = vmul.f32 1.442695, %v928_v6 }
 0x84b   :  { %v929_v10 = vmul.f32 1.442695, %v927_v8  ;;  %v832_v13 = vpop.permute.xlu0 %831 }
 0x84c   :  { %1798 = vpow2.f32 %v931_v9  ;;  %v834_v14 = vmul.f32 %v832_v13, %v1951_v43  ;;  %v835_v32 = vmul.f32 %v832_v13, %v1949_v41  ;;  %v1425_v9 = vld [vmem:[%s2209_s7 + $0x3] ss:$0 sm:$0xff] }
 0x84d   :  { %1800 = vpow2.f32 %v929_v10 }
 0x84e   :  { %v1765_v15 = vpack.i.bf16 %v835_v32, %v834_v14  ;;  %v1273_v14 = vld [vmem:[%s2208_s6] sm:$0xff]  ;;  %v1274_v32 = vld [vmem:[%s2208_s6 + $0x8] sm:$0xff] }
 0x856   :  { %v1799_v62 = vpop.eup %1798 }
 0x857   :  { %v936_v2 = vsel %vm282_vm2, %v1799_v62, 0.0  ;;  %v1801_v11 = vpop.eup %1800 }
 0x858   :  { %937 = vadd.xlane.f32.xlu1 %v936_v2  ;;  %v933_v12 = vsel %vm282_vm2, %v1801_v11, 0.0 }
 0x85c   :  { %934 = vadd.xlane.f32.xlu1 %v933_v12 }
 0x86d   :  { %1766 = vrot.lane.b32.xlu1 %v1765_v15, %s1840_s8  ;;  %v1686_v15 = vpack.c.bf16 %v1274_v32, %v1273_v14 }
 0x8e5   :  { %v938_v19 = vpop.xlane.xlu1 %937 }
 0x8e6   :  { %1802 = vrcp.f32 %v938_v19  ;;  %v1277_v19 = vld [vmem:[%s2208_s6 + $0x20] sm:$0xff] }
 0x8e9   :  { %v935_v22 = vpop.xlane.xlu1 %934 }
 0x8ea   :  { %1804 = vrcp.f32 %v935_v22  ;;  %v1278_v22 = vld [vmem:[%s2208_s6 + $0x28] sm:$0xff] }
 0x8ed   :  { %v1767_v43 = vpop.permute.xlu1 %1766 }
 0x8ee   :  { %v1769_v41 = vunpack.i.h.bf16 %v1767_v43  ;;  %v1768_v21 = vunpack.i.l.bf16 %v1767_v43  ;;  %v1694_v43 = vpack.c.bf16 %v1278_v22, %v1277_v19 }
 0x8f0   :  { %v1666_v20 = vpack.c.bf16 %v1769_v41, %v1768_v21  ;;  %v1803_v23 = vpop.eup %1802  ;;  %v1279_v41 = vld [vmem:[%s2208_s6 + $0x30] sm:$0xff]  ;;  %v1280_v21 = vld [vmem:[%s2208_s6 + $0x38] sm:$0xff] }
 0x8f1   :  { %v942_v26 = vmul.f32 %v1803_v23, %v1799_v62  ;;  %v1281_v23 = vld [vmem:[%s2208_s6 + $0x40] sm:$0xff] }
 0x8f2   :  { %1667 = vmatprep.subr.bf16.mxu1 %v1666_v20 }
 0x8f3   :  { %1669 = vmatpush3.bf16.msra.mxu1 %v1666_v20  ;;  %v1698_v20 = vpack.c.bf16 %v1280_v21, %v1279_v41 }
 0x8f4   :  { %v1805_v24 = vpop.eup %1804  ;;  %1687 = vmatprep.subr.bf16.mxu1 %v1686_v15 }
 0x8f5   :  { %v941_v25 = vmul.f32 %v1805_v24, %v1801_v11  ;;  %v1282_v24 = vld [vmem:[%s2208_s6 + $0x48] sm:$0xff] }
 0x8f7   :  { %1562 = vmatprep.mubr.msk.f32.mxu1 %vm282_vm2, %v941_v25  ;;  %v1283_v25 = vld [vmem:[%s2208_s6 + $0x50] sm:$0xff] }
 0x8f8   :  { %1563 = vmatmul.mubr.msk.f32.vlgmr.msra.gmra.mrb[0].mxu1 %vm282_vm2, %v942_v26  ;;  %v1702_v26 = vpack.c.bf16 %v1282_v24, %v1281_v23  ;;  %v1706_v28 = vpack.c.bf16 %v1284_v27, %v1283_v25 }
 0x8f9   :  { %1689 = vmatpush3.bf16.msra.mxu1 %v1686_v15 }
 0x8fa   :  { %1691 = vmatprep.subr.bf16.mxu1 %v1690_v18 }
 0x8fd   :  { %1693 = vmatpush3.bf16.msra.mxu1 %v1690_v18 }
 0x8fe   :  { %1695 = vmatprep.subr.bf16.mxu1 %v1694_v43 }
 0x901   :  { %1697 = vmatpush3.bf16.msra.mxu1 %v1694_v43 }
 0x902   :  { %1699 = vmatprep.subr.bf16.mxu1 %v1698_v20 }
 0x905   :  { %1701 = vmatpush3.bf16.msra.mxu1 %v1698_v20 }
 0x906   :  { %1703 = vmatprep.subr.bf16.mxu1 %v1702_v26 }
 0x909   :  { %1705 = vmatpush3.bf16.msra.mxu1 %v1702_v26 }
 0x90a   :  { %1707 = vmatprep.subr.bf16.mxu1 %v1706_v28 }
 0x90d   :  { %1709 = vmatpush3.bf16.msra.mxu1 %v1706_v28 }
 0x9cb   :  { %v1564_v30 = vpop.f32.mrb[0].mxu1 }
 0x9cc   :  { %v1718_v31 = vadd.f32 %v1564_v30, %v2033_v61  ;;  %v1023_v33 = vpop.f32.mrb[1].mxu1  ;;  %v1286_v30 = vld [vmem:[%s2208_s6 + $0x68] sm:$0xff] }
 0x9cd   :  { %v1719_v34 = vadd.f32 %v1023_v33, %v2035_v63  ;;  %v1287_v33 = vld [vmem:[%s2208_s6 + $0x70] sm:$0xff] }
 0x9cf   :  { %1573 = vmatprep.mubr.msk.f32.mxu0 %vm43_vm0, %v1719_v34  ;;  %v1288_v34 = vld [vmem:[%s2208_s6 + $0x78] sm:$0xff] }
 0x9d0   :  { %1574 = vmatmul.mubr.msk.f32.vlgmr.msra.gmra.mrb[10].mxu0 %vm43_vm0, %v1718_v31  ;;  %v1710_v31 = vpack.c.bf16 %v1286_v30, %v1285_v29 }
 0x9d1   :  { %1681 = vmatpush3.bf16.msra.mxu0 %v1678_v55 }
 0x9d2   :  { %1683 = vmatprep.subr.bf16.mxu0 %v1682_v58  ;;  %1711 = vmatprep.subr.bf16.mxu1 %v1710_v31 }
 0x9d3   :  { %1713 = vmatpush3.bf16.msra.mxu1 %v1710_v31 }
 0x9d5   :  { %1685 = vmatpush3.bf16.msra.mxu0 %v1682_v58 }
 0xaa3   :  { %v1575_v36 = vpop.f32.mrb[10].mxu0 }
 0xaa4   :  { %v1120_v37 = vadd.f32 %v1575_v36, %v1421_v35  ;;  %v1114_v38 = vpop.f32.mrb[11].mxu0  ;;  %v1426_v36 = vld [vmem:[%s2207_s5] ss:$0 sm:$0xff] }
 0xaa5   :  { %v1115_v39 = vadd.f32 %v1421_v35, %v1114_v38  ;;  %v1714_v35 = vpack.c.bf16 %v1288_v34, %v1287_v33 }
 0xaa6   :  { %v2099_v40 = vadd.f32 %v1120_v37, %v1902_v1 }
 0xaa7   :  { %v2102_v61 = vadd.f32 %v1115_v39, %v1897_v0  ;;  %1715 = vmatprep.subr.bf16.mxu1 %v1714_v35 }
 0xaa8   :  { %v1128_v63 = vsel %vm43_vm0, %v2099_v40, 0.0  ;;  %1717 = vmatpush3.bf16.msra.mxu1 %v1714_v35 }
 0xaa9   :  { %1129 = vadd.xlane.f32.xlu1 %v1128_v63  ;;  %v1125_v42 = vsel %vm43_vm0, %v2102_v61, 0.0 }
 0xaaa   :  { %1126 = vadd.xlane.f32.xlu0 %v1125_v42 }
 0xb36   :  { %v1130_v44 = vpop.xlane.xlu1 %1129 }
 0xb37   :  { %v1132_v45 = vmul.f32 0.03125, %v1130_v44  ;;  %v1127_v46 = vpop.xlane.xlu0 %1126 }
 0xb38   :  { %v1131_v47 = vmul.f32 0.03125, %v1127_v46 }
 0xb39   :  { %v1134_v48 = vsub.f32 %v2099_v40, %v1132_v45 }
 0xb3a   :  { %v1133_v1 = vsub.f32 %v2102_v61, %v1131_v47 }
 0xb3b   :  { %v1136_v50 = vmul.f32 %v1134_v48, %v1134_v48 }
 0xb3c   :  { %v1135_v49 = vmul.f32 %v1133_v1, %v1133_v1 }
 0xb3d   :  { %v1140_v51 = vsel %vm43_vm0, %v1136_v50, 0.0 }
 0xb3e   :  { %v1137_v0 = vsel %vm43_vm0, %v1135_v49, 0.0 }
 0xb3f   :  { %1138 = vadd.xlane.f32.xlu0 %v1137_v0 }
 0xb43   :  { %1141 = vadd.xlane.f32.xlu0 %v1140_v51 }
 0xbcc   :  { %v1139_v59 = vpop.xlane.xlu0 %1138 }
 0xbcd   :  { %v1143_v60 = vmul.f32 0.03125, %v1139_v59 }
 0xbcf   :  { %v1145_v3 = vadd.f32 1e-05, %v1143_v60  ;;  %v1429_v60 = vld [vmem:[%s2209_s7 + $0x5] ss:$0 sm:$0xff] }
 0xbd0   :  { %v1142_v4 = vpop.xlane.xlu0 %1141 }
 0xbd1   :  { %1806 = vrsqrt.f32 %v1145_v3  ;;  %v1144_v5 = vmul.f32 0.03125, %v1142_v4 }
 0xbd3   :  { %v1146_v54 = vadd.f32 1e-05, %v1144_v5 }
 0xbd5   :  { %1808 = vrsqrt.f32 %v1146_v54 }
 0xbdb   :  { %v1807_v6 = vpop.eup %1806 }
 0xbdc   :  { %v1149_v8 = vmul.f32 %v1807_v6, %v1133_v1 }
 0xbde   :  { %v1155_v10 = vmul.f32 %v1424_v7, %v1149_v8 }
 0xbdf   :  { %v1809_v62 = vpop.eup %1808 }
 0xbe0   :  { %v1150_v2 = vmul.f32 %v1809_v62, %v1134_v48  ;;  %v1161_v11 = vadd.f32 %v1425_v9, %v1155_v10 }
 0xbe2   :  { %v1156_v12 = vmul.f32 %v1424_v7, %v1150_v2  ;;  %1584 = vmatprep.mubr.msk.f32.mxu0 %vm43_vm0, %v1161_v11 }
 0xbe4   :  { %v1162_v13 = vadd.f32 %v1425_v9, %v1156_v12 }
 0xbe6   :  { %1585 = vmatmul.mubr.msk.f32.vlgmr.msra.gmra.mrb[12].mxu0 %vm43_vm0, %v1162_v13 }
 0xcb9   :  { %v1586_v37 = vpop.f32.mrb[12].mxu0 }
 0xcba   :  { %v1252_v38 = vadd.f32 %v1586_v37, %v1426_v36  ;;  %v1246_v39 = vpop.f32.mrb[13].mxu0 }
 0xcbb   :  { %v1247_v63 = vadd.f32 %v1426_v36, %v1246_v39 }
 0xcbc   :  { %v1256_v42 = vmul.f32 %v1252_v38, %v1252_v38 }
 0xcbd   :  { %v1255_v44 = vmul.f32 %v1247_v63, %v1247_v63 }
 0xcbe   :  { %v1258_v45 = vmul.f32 %v1256_v42, %v1252_v38 }
 0xcbf   :  { %v1257_v46 = vmul.f32 %v1255_v44, %v1247_v63 }
 0xcc0   :  { %v1260_v47 = vmul.f32 0.044715, %v1258_v45 }
 0xcc1   :  { %v1259_v48 = vmul.f32 0.044715, %v1257_v46 }
 0xcc2   :  { %v1262_v1 = vadd.f32 %v1260_v47, %v1252_v38 }
 0xcc3   :  { %v1261_v49 = vadd.f32 %v1259_v48, %v1247_v63 }
 0xcc4   :  { %v1264_v0 = vmul.f32 0.7978846, %v1262_v1 }
 0xcc5   :  { %v1263_v50 = vmul.f32 0.7978846, %v1261_v49 }
 0xcc6   :  { %1810 = vtanh.f32 %v1264_v0 }
 0xcc7   :  { %1812 = vtanh.f32 %v1263_v50 }
 0xcd0   :  { %v1811_v51 = vpop.eup %1810 }
 0xcd1   :  { %v1813_v52 = vpop.eup %1812  ;;  %v1268_v53 = vadd.f32 1.0, %v1811_v51 }
 0xcd2   :  { %v1267_v55 = vadd.f32 1.0, %v1813_v52 }
 0xcd3   :  { %v1270_v56 = vmul.f32 0.5, %v1268_v53 }
 0xcd4   :  { %v1269_v57 = vmul.f32 0.5, %v1267_v55 }
 0xcd5   :  { %v1272_v59 = vmul.f32 %v1270_v56, %v1252_v38 }
 0xcd6   :  { %v1271_v58 = vmul.f32 %v1269_v57, %v1247_v63 }
 0xcd8   :  { %1619 = vmatprep.mubr.f32.mxu1 %v1271_v58 }
 0xcd9   :  { %1620 = vmatmul.mubr.f32.vlgmr.msra.gmra.mrb[4].mxu1 %v1272_v59 }
 0xdac   :  { %v1621_v3 = vpop.f32.mrb[4].mxu1 }
 0xdad   :  { %v1365_v4 = vadd.f32 %v1621_v3, %v1429_v60  ;;  %v1359_v5 = vpop.f32.mrb[5].mxu1 }
 0xdae   :  { %v1360_v54 = vadd.f32 %v1429_v60, %v1359_v5 }
 0xdaf   :  { %v1369_v6 = vadd.f32 %v1365_v4, %v2099_v40 }
 0xdb0   :  { %v1368_v7 = vadd.f32 %v1360_v54, %v2102_v61 }
 0xdb1   :  { %1371 = vst.msk [vmem:[#allocation2 + $0x8] sm:$0xff] %vm43_vm0, %v1369_v6 }
 0xdb2   :  { %1370 = vst.msk [vmem:[#allocation2] sm:$0xff] %vm43_vm0, %v1368_v7 }
 0xdb3   :  { %1825 = shalt.err (!%p1822_p4)
}
 0xdb4   :  { %s1826_s22 = scalar_lea.hbm %s2211_s9, 256 }
 0xdb5   :  { %p1827_p5 = scmp.ne.s32.totalorder %s2211_s9, %s1826_s22  ;;  %p1830_p6 = scmp.lt.u32.totalorder %s1826_s22, %s2211_s9 }
 0xdb7   :  { %p1832_p7 = pnand %p1830_p6, %p1827_p5 }
 0xdb9   :  { %1835 = shalt.err (!%p1832_p7)
}
 0xdba   :  { %s1842_s25 = smov 128   ;;  %s1843_s26 = smov 8  }
 0xdbb   :  { %1383 = dma.vmem_to_hbm [thread:$0]  %s1378_s19, 256, %s2211_s9, [#allocation3], %s1842_s25, %s1842_s25, %s1843_s26  }
 0xdbc   :  { %1836 = dma.done.wait [#allocation3], 256  }
 0xdbd   :  { %1837 = vsyncadd [#allocation3], 4294967040 }
 0xdbe   :  { %1387 = vsyncpa [#allocation3], 1 }

</bundles_post_ra>
